<compile_context>
chip_gen: v7x
topology: tpu7x:2x2x1
jax: 0.10.0
libtpu: 0.0.40
codegen_flags: <defaults>
</compile_context>

<pallas_src>
import math
import functools

import jax
import jax.numpy as jnp
from jax.experimental import pallas as pl
from jax.experimental.pallas import tpu as pltpu


def mha_kernel(x_ref, wqkv_ref, bqkv_ref, wo_ref, bo_ref, mask_ref, o_ref, *,
               n_heads, head_dim):
    """One grid step == Bt batch elements: fused QKV + per-head attention + one Wo matmul."""
    H, D = n_heads, head_dim
    HD = H * D
    Bt, T, E = x_ref.shape
    M = Bt * T
    EP = wo_ref.shape[1]                       # lane-dense output width

    # ---- fused QKV projection: one wide MXU matmul, bf16 weights, f32 acc ----
    x2 = x_ref[...].reshape(M, E).astype(jnp.bfloat16)           # (M, E)
    qkv = jnp.dot(x2, wqkv_ref[...], preferred_element_type=jnp.float32)
    qkv = qkv + bqkv_ref[...].astype(jnp.float32)                # (M, 3*H*D) f32
    qkv = qkv.astype(jnp.bfloat16)        # single cast (1/sqrt(D) folded into Q)

    mask = mask_ref[...]                  # (1, T, T) additive causal bias (0 / -1e30)

    # ---- per-head attention (batched over Bt); outputs gathered for one Wo dot
    heads_out = []
    for h in range(H):                    # static small H
        q = qkv[:, h * D:(h + 1) * D].reshape(Bt, T, D)
        k = qkv[:, HD + h * D:HD + (h + 1) * D].reshape(Bt, T, D)
        v = qkv[:, 2 * HD + h * D:2 * HD + (h + 1) * D].reshape(Bt, T, D)

        s = jnp.einsum('btd,bsd->bts', q, k,
                       preferred_element_type=jnp.float32)       # (Bt, T, T) f32
        s = s + mask                                             # additive causal bias
        s = s - jnp.max(s, axis=-1, keepdims=True)               # stable softmax
        p = jnp.exp(s)
        p = p * pl.reciprocal(jnp.sum(p, axis=-1, keepdims=True), approx=True)

        o_h = jnp.einsum('bts,bsd->btd', p.astype(jnp.bfloat16), v,
                         preferred_element_type=jnp.float32)     # (Bt, T, D)
        heads_out.append(o_h.astype(jnp.bfloat16))

    # ---- single (M, HD) @ (HD, EP) output projection + bias -----------------
    cat = jnp.concatenate(heads_out, axis=-1).reshape(M, HD)     # (M, HD) bf16
    out = jnp.dot(cat, wo_ref[...], preferred_element_type=jnp.float32)
    out = out + bo_ref[...].astype(jnp.float32)                  # (M, EP) f32
    o_ref[...] = out.reshape(Bt, T, EP).astype(o_ref.dtype)      # lane-dense store


def _pick_batch_tile(B, T, *, rows_target=256, prefer_multi_step=False):
    """Batch elements per grid step.

    Default: aim for >= rows_target matmul rows (Bt*T) per step to fill the MXU
    and amortize the ~0.35 us/step overhead (fewest, largest steps on 1-TC
    v5e/v6e).  On v7x (2 TensorCores) prefer >= 2 parallel grid steps whenever
    B allows, even if each step has fewer rows.
    """
    bt = min(B, max(1, -(-rows_target // T)))      # ceil(rows_target / T), capped at B
    while B % bt:
        bt -= 1
    if prefer_multi_step and (B // bt) < 2 and B > 1:
        bt = max(1, B // 2)
        while B % bt:
            bt -= 1
    return bt


def multi_head_attention(x, wq, bq, wk, bk, wv, bv, wo, bo, *, batch_tile=None):
    """x: (B, T, E); per-head weights stacked (H, E, D), biases (H, 1, D);
       output projection wo: (H*D, E), bo: (1, E).  Returns (B, T, E)."""
    B, T, E = x.shape
    H, _, D = wq.shape
    HD = H * D
    scale = 1.0 / math.sqrt(D)

    # ---- wrapper-side weight packing (bf16 shipped to the kernel) ------------
    def stack(w):  # (H, E, D) -> (E, H*D); column order h*D + d matches torch.cat
        return jnp.transpose(w, (1, 0, 2)).reshape(E, HD)

    w_qkv = jnp.concatenate([stack(wq) * scale, stack(wk), stack(wv)],
                            axis=1).astype(jnp.bfloat16)                  # (E, 3HD)
    b_qkv = jnp.concatenate([bq.reshape(1, HD) * scale,
                             bk.reshape(1, HD),
                             bv.reshape(1, HD)], axis=1).astype(jnp.bfloat16)  # (1, 3HD)

    # Lane-pad the output projection only when E is not already 128-aligned.
    if E % 128 == 0:
        EP = E
        wo_p = wo.astype(jnp.bfloat16)
        bo_p = bo.astype(jnp.bfloat16)
    else:
        EP = ((E + 127) // 128) * 128
        wo_p = jnp.zeros((HD, EP), jnp.bfloat16).at[:, :E].set(wo.astype(jnp.bfloat16))
        bo_p = jnp.zeros((1, EP), jnp.bfloat16).at[:, :E].set(bo.astype(jnp.bfloat16))

    # Precomputed additive causal mask (0 on allowed, -1e30 on masked).
    causal = jnp.tril(jnp.ones((T, T), dtype=jnp.bool_))
    mask_add = jnp.where(causal, 0.0, -1e30).astype(jnp.float32)[None]    # (1, T, T)

    # ---- generation-aware tiling ---------------------------------------------
    try:
        kind = jax.devices()[0].device_kind.lower()
    except Exception:  # pragma: no cover
        kind = ""
    is_v7 = "v7" in kind
    Bt = batch_tile if batch_tile is not None else _pick_batch_tile(
        B, T, rows_target=256, prefer_multi_step=is_v7)
    assert B % Bt == 0
    grid = (B // Bt,)
    M_blk = Bt * T

    # ---- VMEM budget derived from the actual block footprint -----------------
    itemsize = jnp.dtype(x.dtype).itemsize
    in_bytes = Bt * T * E * itemsize
    out_bytes = Bt * T * EP * itemsize
    w_bytes = ((w_qkv.size + wo_p.size + b_qkv.size + bo_p.size) * 2
               + mask_add.size * 4)
    tmp_bytes = (M_blk * 3 * HD * (4 + 2)        # qkv f32 + bf16 copy
                 + 2 * Bt * T * T * 4            # scores / probs (f32)
                 + M_blk * (HD * 2 + EP * 4))    # cat (bf16) + out accumulator (f32)
    need = 2 * (in_bytes + out_bytes + w_bytes) + tmp_bytes   # 2x: double-buffering
    vmem_limit = int(min(64 << 20, max(16 << 20, 2 * need)))  # clamp to v7x physical

    kernel = functools.partial(mha_kernel, n_heads=H, head_dim=D)

    flops = int(2 * B * T * (E * 3 * HD) + 4 * B * H * T * T * D + 2 * B * T * HD * EP)
    bytes_accessed = int(B * T * E * itemsize + B * T * EP * itemsize
                         + 2 * (w_qkv.size + b_qkv.size + wo_p.size + bo_p.size)
                         + 4 * mask_add.size)

    out = pl.pallas_call(
        kernel,
        out_shape=jax.ShapeDtypeStruct((B, T, EP), x.dtype),
        grid_spec=pltpu.PrefetchScalarGridSpec(
            num_scalar_prefetch=0,
            grid=grid,
            in_specs=[
                pl.BlockSpec((Bt, T, E), lambda b: (b, 0, 0)),   # x block
                pl.BlockSpec((E, 3 * HD), lambda b: (0, 0)),     # fused W_qkv (bf16)
                pl.BlockSpec((1, 3 * HD), lambda b: (0, 0)),     # fused b_qkv (bf16)
                pl.BlockSpec((HD, EP), lambda b: (0, 0)),        # W_o (bf16, lane-dense)
                pl.BlockSpec((1, EP), lambda b: (0, 0)),         # b_o (bf16)
                pl.BlockSpec((1, T, T), lambda b: (0, 0, 0)),    # additive causal mask
            ],
            out_specs=pl.BlockSpec((Bt, T, EP), lambda b: (b, 0, 0)),
        ),
        compiler_params=pltpu.CompilerParams(
            dimension_semantics=("parallel",),
            vmem_limit_bytes=vmem_limit,
        ),
        cost_estimate=pl.CostEstimate(
            flops=flops,
            transcendentals=int(B * H * T * T),
            bytes_accessed=bytes_accessed,
        ),
    )(x, w_qkv, b_qkv, wo_p, bo_p, mask_add)

    return out if EP == E else out[..., :E]


def _reference(x, wq, bq, wk, bk, wv, bv, wo, bo):
    """Pure-JAX f32 reference mirroring the PyTorch forward exactly."""
    H, E, D = wq.shape
    outs = []
    for h in range(H):
        q = x @ wq[h] + bq[h]
        k = x @ wk[h] + bk[h]
        v = x @ wv[h] + bv[h]
        wei = (q @ jnp.swapaxes(k, -2, -1)) / math.sqrt(D)
        T = x.shape[1]
        tril = jnp.tril(jnp.ones((T, T)))
        wei = jnp.where(tril == 0, -jnp.inf, wei)
        wei = jax.nn.softmax(wei, axis=-1)
        outs.append(wei @ v)
    cat = jnp.concatenate(outs, axis=-1)
    return cat @ wo + bo


if __name__ == "__main__":
    # Small config consistent with the module: n_heads=4, heads_dim=8,
    # embedding_dim=32, sequence_length=8, batch=2.
    B, T, E, H, D = 2, 8, 32, 4, 8

    key = jax.random.PRNGKey(0)
    keys = jax.random.split(key, 10)

    lim_in = 1.0 / math.sqrt(E)      # q/k/v linears: in_features = E
    lim_o = 1.0 / math.sqrt(H * D)   # output linear: in_features = H*D

    x  = jax.random.normal(keys[0], (B, T, E), dtype=jnp.float32)
    wq = jax.random.uniform(keys[1], (H, E, D), jnp.float32, -lim_in, lim_in)
    bq = jax.random.uniform(keys[2], (H, 1, D), jnp.float32, -lim_in, lim_in)
    wk = jax.random.uniform(keys[3], (H, E, D), jnp.float32, -lim_in, lim_in)
    bk = jax.random.uniform(keys[4], (H, 1, D), jnp.float32, -lim_in, lim_in)
    wv = jax.random.uniform(keys[5], (H, E, D), jnp.float32, -lim_in, lim_in)
    bv = jax.random.uniform(keys[6], (H, 1, D), jnp.float32, -lim_in, lim_in)
    wo = jax.random.uniform(keys[7], (H * D, E), jnp.float32, -lim_o, lim_o)
    bo = jax.random.uniform(keys[8], (1, E), jnp.float32, -lim_o, lim_o)

    out = multi_head_attention(x, wq, bq, wk, bk, wv, bv, wo, bo)
    out = jax.block_until_ready(out)

    ref = _reference(x, wq, bq, wk, bk, wv, bv, wo, bo)
    assert out.shape == (B, T, E), out.shape
    # bf16 MXU operands / bf16 weights (f32 accumulation) + approx reciprocal
    # => ~1e-3 abs error at this scale.
    assert jnp.allclose(out, ref, atol=2e-2, rtol=2e-2), (
        "mismatch vs reference; max abs err = "
        f"{float(jnp.max(jnp.abs(out - ref)))}")

    print("KERNEL_OK")
</pallas_src>

<mosaic_0001>
module attributes {stable_mosaic.version = 11 : i64} {
  func.func @mha_kernel(%arg0: i32, %arg1: memref<2x8x32xf32, #tpu.memory_space<vmem>>, %arg2: memref<32x96xbf16, #tpu.memory_space<vmem>>, %arg3: memref<1x96xbf16, #tpu.memory_space<vmem>>, %arg4: memref<32x128xbf16, #tpu.memory_space<vmem>>, %arg5: memref<1x128xbf16, #tpu.memory_space<vmem>>, %arg6: memref<1x8x8xf32, #tpu.memory_space<vmem>>, %arg7: memref<2x8x128xf32, #tpu.memory_space<vmem>>) attributes {dimension_semantics = [#tpu.dimension_semantics<parallel>], iteration_bounds = array<i64: 1>, scalar_prefetch = 0 : i64, scratch_operands = 0 : i64, tpu.core_type = #tpu.core_type<tc>, window_params = [{transform_indices = @transform_0, window_bounds = array<i64: 2, 8, 32>}, {pipeline_mode = #tpu.pipeline_mode<synchronous>, transform_indices = @transform_1, window_bounds = array<i64: 32, 96>}, {pipeline_mode = #tpu.pipeline_mode<synchronous>, transform_indices = @transform_2, window_bounds = array<i64: 1, 96>}, {pipeline_mode = #tpu.pipeline_mode<synchronous>, transform_indices = @transform_3, window_bounds = array<i64: 32, 128>}, {pipeline_mode = #tpu.pipeline_mode<synchronous>, transform_indices = @transform_4, window_bounds = array<i64: 1, 128>}, {pipeline_mode = #tpu.pipeline_mode<synchronous>, transform_indices = @transform_5, window_bounds = array<i64: 1, 8, 8>}, {transform_indices = @transform_6, window_bounds = array<i64: 2, 8, 128>}]} {
    %c0 = arith.constant 0 : index
    %c0_0 = arith.constant 0 : index
    %c0_1 = arith.constant 0 : index
    %0 = vector.load %arg1[%c0, %c0_0, %c0_1] : memref<2x8x32xf32, #tpu.memory_space<vmem>>, vector<2x8x32xf32>
    %1 = vector.shape_cast %0 : vector<2x8x32xf32> to vector<16x32xf32>
    %2 = arith.truncf %1 : vector<16x32xf32> to vector<16x32xbf16>
    %c0_2 = arith.constant 0 : index
    %c0_3 = arith.constant 0 : index
    %3 = vector.load %arg2[%c0_2, %c0_3] : memref<32x96xbf16, #tpu.memory_space<vmem>>, vector<32x96xbf16>
    %cst = arith.constant dense<0.000000e+00> : vector<16x96xf32>
    %4 = tpu.matmul %2, %3, %cst {dimension_numbers = #tpu.dot_dimension_numbers<[1], [0], [0], [1], [0, 0, 1, 1], [], []>} : vector<16x32xbf16>, vector<32x96xbf16>, vector<16x96xf32> -> vector<16x96xf32>
    %c0_4 = arith.constant 0 : index
    %c0_5 = arith.constant 0 : index
    %5 = vector.load %arg3[%c0_4, %c0_5] : memref<1x96xbf16, #tpu.memory_space<vmem>>, vector<1x96xbf16>
    %6 = arith.extf %5 : vector<1x96xbf16> to vector<1x96xf32>
    %7 = vector.broadcast %6 : vector<1x96xf32> to vector<16x96xf32>
    %8 = arith.addf %4, %7 : vector<16x96xf32>
    %9 = arith.truncf %8 : vector<16x96xf32> to vector<16x96xbf16>
    %c0_6 = arith.constant 0 : index
    %c0_7 = arith.constant 0 : index
    %c0_8 = arith.constant 0 : index
    %10 = vector.load %arg6[%c0_6, %c0_7, %c0_8] : memref<1x8x8xf32, #tpu.memory_space<vmem>>, vector<1x8x8xf32>
    %11 = vector.extract_strided_slice %9 {offsets = [0, 0], sizes = [16, 8], strides = [1, 1]} : vector<16x96xbf16> to vector<16x8xbf16>
    %12 = vector.shape_cast %11 : vector<16x8xbf16> to vector<2x8x8xbf16>
    %13 = vector.extract_strided_slice %9 {offsets = [0, 32], sizes = [16, 8], strides = [1, 1]} : vector<16x96xbf16> to vector<16x8xbf16>
    %14 = vector.shape_cast %13 : vector<16x8xbf16> to vector<2x8x8xbf16>
    %15 = vector.extract_strided_slice %9 {offsets = [0, 64], sizes = [16, 8], strides = [1, 1]} : vector<16x96xbf16> to vector<16x8xbf16>
    %16 = vector.shape_cast %15 : vector<16x8xbf16> to vector<2x8x8xbf16>
    "tpu.trace_start"() <{level = 10 : i32, message = "btd,bsd->bts"}> : () -> ()
    %cst_9 = arith.constant dense<0.000000e+00> : vector<2x8x8xf32>
    %17 = tpu.matmul %12, %14, %cst_9 {dimension_numbers = #tpu.dot_dimension_numbers<[2], [2], [1], [1], [0, 0, 0, 1, 1, 1], [0], [0]>} : vector<2x8x8xbf16>, vector<2x8x8xbf16>, vector<2x8x8xf32> -> vector<2x8x8xf32>
    "tpu.trace_stop"() : () -> ()
    %18 = vector.broadcast %10 : vector<1x8x8xf32> to vector<2x8x8xf32>
    %19 = arith.addf %17, %18 : vector<2x8x8xf32>
    %cst_10 = arith.constant dense<0xFF800000> : vector<2x8xf32>
    %20 = vector.multi_reduction <maximumf>, %19, %cst_10 [2] : vector<2x8x8xf32> to vector<2x8xf32>
    %21 = vector.shape_cast %20 : vector<2x8xf32> to vector<2x8x1xf32>
    %22 = vector.broadcast %21 : vector<2x8x1xf32> to vector<2x8x8xf32>
    %23 = arith.subf %19, %22 : vector<2x8x8xf32>
    %24 = math.exp %23 : vector<2x8x8xf32>
    %cst_11 = arith.constant dense<0.000000e+00> : vector<2x8xf32>
    %25 = vector.multi_reduction <add>, %24, %cst_11 [2] : vector<2x8x8xf32> to vector<2x8xf32>
    %26 = vector.shape_cast %25 : vector<2x8xf32> to vector<2x8x1xf32>
    %27 = tpu.reciprocal %26 {approx = true} : vector<2x8x1xf32> -> vector<2x8x1xf32>
    %28 = vector.broadcast %27 : vector<2x8x1xf32> to vector<2x8x8xf32>
    %29 = arith.mulf %24, %28 : vector<2x8x8xf32>
    %30 = arith.truncf %29 : vector<2x8x8xf32> to vector<2x8x8xbf16>
    "tpu.trace_start"() <{level = 10 : i32, message = "bts,bsd->btd"}> : () -> ()
    %cst_12 = arith.constant dense<0.000000e+00> : vector<2x8x8xf32>
    %31 = tpu.matmul %30, %16, %cst_12 {dimension_numbers = #tpu.dot_dimension_numbers<[2], [1], [1], [2], [0, 0, 0, 1, 1, 2], [0], [0]>} : vector<2x8x8xbf16>, vector<2x8x8xbf16>, vector<2x8x8xf32> -> vector<2x8x8xf32>
    "tpu.trace_stop"() : () -> ()
    %32 = arith.truncf %31 : vector<2x8x8xf32> to vector<2x8x8xbf16>
    %33 = vector.extract_strided_slice %9 {offsets = [0, 8], sizes = [16, 8], strides = [1, 1]} : vector<16x96xbf16> to vector<16x8xbf16>
    %34 = vector.shape_cast %33 : vector<16x8xbf16> to vector<2x8x8xbf16>
    %35 = vector.extract_strided_slice %9 {offsets = [0, 40], sizes = [16, 8], strides = [1, 1]} : vector<16x96xbf16> to vector<16x8xbf16>
    %36 = vector.shape_cast %35 : vector<16x8xbf16> to vector<2x8x8xbf16>
    %37 = vector.extract_strided_slice %9 {offsets = [0, 72], sizes = [16, 8], strides = [1, 1]} : vector<16x96xbf16> to vector<16x8xbf16>
    %38 = vector.shape_cast %37 : vector<16x8xbf16> to vector<2x8x8xbf16>
    "tpu.trace_start"() <{level = 10 : i32, message = "btd,bsd->bts"}> : () -> ()
    %cst_13 = arith.constant dense<0.000000e+00> : vector<2x8x8xf32>
    %39 = tpu.matmul %34, %36, %cst_13 {dimension_numbers = #tpu.dot_dimension_numbers<[2], [2], [1], [1], [0, 0, 0, 1, 1, 1], [0], [0]>} : vector<2x8x8xbf16>, vector<2x8x8xbf16>, vector<2x8x8xf32> -> vector<2x8x8xf32>
    "tpu.trace_stop"() : () -> ()
    %40 = vector.broadcast %10 : vector<1x8x8xf32> to vector<2x8x8xf32>
    %41 = arith.addf %39, %40 : vector<2x8x8xf32>
    %cst_14 = arith.constant dense<0xFF800000> : vector<2x8xf32>
    %42 = vector.multi_reduction <maximumf>, %41, %cst_14 [2] : vector<2x8x8xf32> to vector<2x8xf32>
    %43 = vector.shape_cast %42 : vector<2x8xf32> to vector<2x8x1xf32>
    %44 = vector.broadcast %43 : vector<2x8x1xf32> to vector<2x8x8xf32>
    %45 = arith.subf %41, %44 : vector<2x8x8xf32>
    %46 = math.exp %45 : vector<2x8x8xf32>
    %cst_15 = arith.constant dense<0.000000e+00> : vector<2x8xf32>
    %47 = vector.multi_reduction <add>, %46, %cst_15 [2] : vector<2x8x8xf32> to vector<2x8xf32>
    %48 = vector.shape_cast %47 : vector<2x8xf32> to vector<2x8x1xf32>
    %49 = tpu.reciprocal %48 {approx = true} : vector<2x8x1xf32> -> vector<2x8x1xf32>
    %50 = vector.broadcast %49 : vector<2x8x1xf32> to vector<2x8x8xf32>
    %51 = arith.mulf %46, %50 : vector<2x8x8xf32>
    %52 = arith.truncf %51 : vector<2x8x8xf32> to vector<2x8x8xbf16>
    "tpu.trace_start"() <{level = 10 : i32, message = "bts,bsd->btd"}> : () -> ()
    %cst_16 = arith.constant dense<0.000000e+00> : vector<2x8x8xf32>
    %53 = tpu.matmul %52, %38, %cst_16 {dimension_numbers = #tpu.dot_dimension_numbers<[2], [1], [1], [2], [0, 0, 0, 1, 1, 2], [0], [0]>} : vector<2x8x8xbf16>, vector<2x8x8xbf16>, vector<2x8x8xf32> -> vector<2x8x8xf32>
    "tpu.trace_stop"() : () -> ()
    %54 = arith.truncf %53 : vector<2x8x8xf32> to vector<2x8x8xbf16>
    %55 = vector.extract_strided_slice %9 {offsets = [0, 16], sizes = [16, 8], strides = [1, 1]} : vector<16x96xbf16> to vector<16x8xbf16>
    %56 = vector.shape_cast %55 : vector<16x8xbf16> to vector<2x8x8xbf16>
    %57 = vector.extract_strided_slice %9 {offsets = [0, 48], sizes = [16, 8], strides = [1, 1]} : vector<16x96xbf16> to vector<16x8xbf16>
    %58 = vector.shape_cast %57 : vector<16x8xbf16> to vector<2x8x8xbf16>
    %59 = vector.extract_strided_slice %9 {offsets = [0, 80], sizes = [16, 8], strides = [1, 1]} : vector<16x96xbf16> to vector<16x8xbf16>
    %60 = vector.shape_cast %59 : vector<16x8xbf16> to vector<2x8x8xbf16>
    "tpu.trace_start"() <{level = 10 : i32, message = "btd,bsd->bts"}> : () -> ()
    %cst_17 = arith.constant dense<0.000000e+00> : vector<2x8x8xf32>
    %61 = tpu.matmul %56, %58, %cst_17 {dimension_numbers = #tpu.dot_dimension_numbers<[2], [2], [1], [1], [0, 0, 0, 1, 1, 1], [0], [0]>} : vector<2x8x8xbf16>, vector<2x8x8xbf16>, vector<2x8x8xf32> -> vector<2x8x8xf32>
    "tpu.trace_stop"() : () -> ()
    %62 = vector.broadcast %10 : vector<1x8x8xf32> to vector<2x8x8xf32>
    %63 = arith.addf %61, %62 : vector<2x8x8xf32>
    %cst_18 = arith.constant dense<0xFF800000> : vector<2x8xf32>
    %64 = vector.multi_reduction <maximumf>, %63, %cst_18 [2] : vector<2x8x8xf32> to vector<2x8xf32>
    %65 = vector.shape_cast %64 : vector<2x8xf32> to vector<2x8x1xf32>
    %66 = vector.broadcast %65 : vector<2x8x1xf32> to vector<2x8x8xf32>
    %67 = arith.subf %63, %66 : vector<2x8x8xf32>
    %68 = math.exp %67 : vector<2x8x8xf32>
    %cst_19 = arith.constant dense<0.000000e+00> : vector<2x8xf32>
    %69 = vector.multi_reduction <add>, %68, %cst_19 [2] : vector<2x8x8xf32> to vector<2x8xf32>
    %70 = vector.shape_cast %69 : vector<2x8xf32> to vector<2x8x1xf32>
    %71 = tpu.reciprocal %70 {approx = true} : vector<2x8x1xf32> -> vector<2x8x1xf32>
    %72 = vector.broadcast %71 : vector<2x8x1xf32> to vector<2x8x8xf32>
    %73 = arith.mulf %68, %72 : vector<2x8x8xf32>
    %74 = arith.truncf %73 : vector<2x8x8xf32> to vector<2x8x8xbf16>
    "tpu.trace_start"() <{level = 10 : i32, message = "bts,bsd->btd"}> : () -> ()
    %cst_20 = arith.constant dense<0.000000e+00> : vector<2x8x8xf32>
    %75 = tpu.matmul %74, %60, %cst_20 {dimension_numbers = #tpu.dot_dimension_numbers<[2], [1], [1], [2], [0, 0, 0, 1, 1, 2], [0], [0]>} : vector<2x8x8xbf16>, vector<2x8x8xbf16>, vector<2x8x8xf32> -> vector<2x8x8xf32>
    "tpu.trace_stop"() : () -> ()
    %76 = arith.truncf %75 : vector<2x8x8xf32> to vector<2x8x8xbf16>
    %77 = vector.extract_strided_slice %9 {offsets = [0, 24], sizes = [16, 8], strides = [1, 1]} : vector<16x96xbf16> to vector<16x8xbf16>
    %78 = vector.shape_cast %77 : vector<16x8xbf16> to vector<2x8x8xbf16>
    %79 = vector.extract_strided_slice %9 {offsets = [0, 56], sizes = [16, 8], strides = [1, 1]} : vector<16x96xbf16> to vector<16x8xbf16>
    %80 = vector.shape_cast %79 : vector<16x8xbf16> to vector<2x8x8xbf16>
    %81 = vector.extract_strided_slice %9 {offsets = [0, 88], sizes = [16, 8], strides = [1, 1]} : vector<16x96xbf16> to vector<16x8xbf16>
    %82 = vector.shape_cast %81 : vector<16x8xbf16> to vector<2x8x8xbf16>
    "tpu.trace_start"() <{level = 10 : i32, message = "btd,bsd->bts"}> : () -> ()
    %cst_21 = arith.constant dense<0.000000e+00> : vector<2x8x8xf32>
    %83 = tpu.matmul %78, %80, %cst_21 {dimension_numbers = #tpu.dot_dimension_numbers<[2], [2], [1], [1], [0, 0, 0, 1, 1, 1], [0], [0]>} : vector<2x8x8xbf16>, vector<2x8x8xbf16>, vector<2x8x8xf32> -> vector<2x8x8xf32>
    "tpu.trace_stop"() : () -> ()
    %84 = vector.broadcast %10 : vector<1x8x8xf32> to vector<2x8x8xf32>
    %85 = arith.addf %83, %84 : vector<2x8x8xf32>
    %cst_22 = arith.constant dense<0xFF800000> : vector<2x8xf32>
    %86 = vector.multi_reduction <maximumf>, %85, %cst_22 [2] : vector<2x8x8xf32> to vector<2x8xf32>
    %87 = vector.shape_cast %86 : vector<2x8xf32> to vector<2x8x1xf32>
    %88 = vector.broadcast %87 : vector<2x8x1xf32> to vector<2x8x8xf32>
    %89 = arith.subf %85, %88 : vector<2x8x8xf32>
    %90 = math.exp %89 : vector<2x8x8xf32>
    %cst_23 = arith.constant dense<0.000000e+00> : vector<2x8xf32>
    %91 = vector.multi_reduction <add>, %90, %cst_23 [2] : vector<2x8x8xf32> to vector<2x8xf32>
    %92 = vector.shape_cast %91 : vector<2x8xf32> to vector<2x8x1xf32>
    %93 = tpu.reciprocal %92 {approx = true} : vector<2x8x1xf32> -> vector<2x8x1xf32>
    %94 = vector.broadcast %93 : vector<2x8x1xf32> to vector<2x8x8xf32>
    %95 = arith.mulf %90, %94 : vector<2x8x8xf32>
    %96 = arith.truncf %95 : vector<2x8x8xf32> to vector<2x8x8xbf16>
    "tpu.trace_start"() <{level = 10 : i32, message = "bts,bsd->btd"}> : () -> ()
    %cst_24 = arith.constant dense<0.000000e+00> : vector<2x8x8xf32>
    %97 = tpu.matmul %96, %82, %cst_24 {dimension_numbers = #tpu.dot_dimension_numbers<[2], [1], [1], [2], [0, 0, 0, 1, 1, 2], [0], [0]>} : vector<2x8x8xbf16>, vector<2x8x8xbf16>, vector<2x8x8xf32> -> vector<2x8x8xf32>
    "tpu.trace_stop"() : () -> ()
    %98 = arith.truncf %97 : vector<2x8x8xf32> to vector<2x8x8xbf16>
    %99 = tpu.concatenate %32, %54, %76, %98 in 2 : vector<2x8x8xbf16>, vector<2x8x8xbf16>, vector<2x8x8xbf16>, vector<2x8x8xbf16> -> vector<2x8x32xbf16>
    %100 = vector.shape_cast %99 : vector<2x8x32xbf16> to vector<16x32xbf16>
    %c0_25 = arith.constant 0 : index
    %c0_26 = arith.constant 0 : index
    %101 = vector.load %arg4[%c0_25, %c0_26] : memref<32x128xbf16, #tpu.memory_space<vmem>>, vector<32x128xbf16>
    %cst_27 = arith.constant dense<0.000000e+00> : vector<16x128xf32>
    %102 = tpu.matmul %100, %101, %cst_27 {dimension_numbers = #tpu.dot_dimension_numbers<[1], [0], [0], [1], [0, 0, 1, 1], [], []>} : vector<16x32xbf16>, vector<32x128xbf16>, vector<16x128xf32> -> vector<16x128xf32>
    %c0_28 = arith.constant 0 : index
    %c0_29 = arith.constant 0 : index
    %103 = vector.load %arg5[%c0_28, %c0_29] : memref<1x128xbf16, #tpu.memory_space<vmem>>, vector<1x128xbf16>
    %104 = arith.extf %103 : vector<1x128xbf16> to vector<1x128xf32>
    %105 = vector.broadcast %104 : vector<1x128xf32> to vector<16x128xf32>
    %106 = arith.addf %102, %105 : vector<16x128xf32>
    %107 = vector.shape_cast %106 : vector<16x128xf32> to vector<2x8x128xf32>
    %c0_30 = arith.constant 0 : index
    %c0_31 = arith.constant 0 : index
    %c0_32 = arith.constant 0 : index
    %108 = vector.load %arg7[%c0_30, %c0_31, %c0_32] : memref<2x8x128xf32, #tpu.memory_space<vmem>>, vector<2x8x128xf32>
    tpu.vector_store %arg7[%c0_30, %c0_31, %c0_32], %107 {strides = array<i32>} : memref<2x8x128xf32, #tpu.memory_space<vmem>>, vector<2x8x128xf32>,
    return
  }
  func.func @transform_0(%arg0: i32) -> (i32, i32, i32) {
    %c0_i32 = arith.constant 0 : i32
    %c0_i32_0 = arith.constant 0 : i32
    %c0_i32_1 = arith.constant 0 : i32
    return %arg0, %c0_i32, %c0_i32_0 : i32, i32, i32
  }
  func.func @transform_1(%arg0: i32) -> (i32, i32) {
    %c0_i32 = arith.constant 0 : i32
    %c0_i32_0 = arith.constant 0 : i32
    %c0_i32_1 = arith.constant 0 : i32
    return %c0_i32, %c0_i32_0 : i32, i32
  }
  func.func @transform_2(%arg0: i32) -> (i32, i32) {
    %c0_i32 = arith.constant 0 : i32
    %c0_i32_0 = arith.constant 0 : i32
    %c0_i32_1 = arith.constant 0 : i32
    return %c0_i32, %c0_i32_0 : i32, i32
  }
  func.func @transform_3(%arg0: i32) -> (i32, i32) {
    %c0_i32 = arith.constant 0 : i32
    %c0_i32_0 = arith.constant 0 : i32
    %c0_i32_1 = arith.constant 0 : i32
    return %c0_i32, %c0_i32_0 : i32, i32
  }
  func.func @transform_4(%arg0: i32) -> (i32, i32) {
    %c0_i32 = arith.constant 0 : i32
    %c0_i32_0 = arith.constant 0 : i32
    %c0_i32_1 = arith.constant 0 : i32
    return %c0_i32, %c0_i32_0 : i32, i32
  }
  func.func @transform_5(%arg0: i32) -> (i32, i32, i32) {
    %c0_i32 = arith.constant 0 : i32
    %c0_i32_0 = arith.constant 0 : i32
    %c0_i32_1 = arith.constant 0 : i32
    %c0_i32_2 = arith.constant 0 : i32
    return %c0_i32, %c0_i32_0, %c0_i32_1 : i32, i32, i32
  }
  func.func @transform_6(%arg0: i32) -> (i32, i32, i32) {
    %c0_i32 = arith.constant 0 : i32
    %c0_i32_0 = arith.constant 0 : i32
    %c0_i32_1 = arith.constant 0 : i32
    return %arg0, %c0_i32, %c0_i32_0 : i32, i32, i32
  }
}

</mosaic_0001>

<bundles_post_ra>
// kernel: tpu_custom_call.1
= control target key start
LH: loop header
LB: loop body
LE: loop exit
PB: predicated region body
PF: predicated region fallthrough
CT: control target
= control target key end

     0   :  { %11 = vsyncpa [#allocation3], 0  ;;  %s1782_s0 = inlined_call_operand.hbm [shape: f32[2,8,32], index: 0, kind: input, shape index: {}]   ;;  %s1783_s1 = inlined_call_operand.hbm [shape: bf16[32,96], index: 1, kind: input, shape index: {}]   ;;  %s1784_s2 = inlined_call_operand.vmem [shape: bf16[1,96], index: 2, kind: input, shape index: {}]   ;;  %s1785_s3 = inlined_call_operand.hbm [shape: bf16[32,128], index: 3, kind: input, shape index: {}]   ;;  %s1786_s4 = inlined_call_operand.vmem [shape: bf16[1,128], index: 4, kind: input, shape index: {}]   ;;  %s1787_s5 = inlined_call_operand.vmem [shape: f32[1,8,8], index: 5, kind: input, shape index: {}]   ;;  %s1788_s6 = inlined_call_operand.hbm [shape: f32[2,8,128], index: 6, kind: output, shape index: {}]  }
   0x1   :  { %12 = vsyncpa [#allocation6], 0 }
   0x2   :  { %13 = vsyncpa [#allocation4], 0  ;;  %s1483_s21 = smov [#allocation5]   ;;  %s1389_s25 = scalar_lea.hbm %s1783_s1, 256 }
   0x3   :  { %s31_s22 = sshll.u32 %s1483_s21, 4  ;;  %p1390_p0 = scmp.ne.s32.totalorder %s1783_s1, %s1389_s25  ;;  %s32_s22 = int_to_ptr.vmem [resolvable:$true] %s31_s22 }
   0x4   :  { %p1393_p1 = scmp.lt.u32.totalorder %s1389_s25, %s1783_s1 }
   0x6   :  { %p1395_p2 = pnand %p1393_p1, %p1390_p0 }
   0x8   :  { %1398 = shalt.err (!%p1395_p2)
}
   0x9   :  { %s1399_s30 = scalar_lea.vmem %s32_s22, 256  ;;  %p1404_p4 = scmp.lt.s32.totalorder %s32_s22, %s32_s22 }
   0xa   :  { %p1400_p3 = scmp.ne.s32.totalorder %s32_s22, %s1399_s30  ;;  %p1405_p5 = scmp.lt.s32.totalorder %s1399_s30, %s1399_s30 }
   0xc   :  { %p1406_p6 = por %p1405_p5, %p1404_p4 }
   0xe   :  { %p1407_p7 = pnand %p1406_p6, %p1400_p3 }
  0x10   :  { %1410 = shalt.err (!%p1407_p7)
}
  0x11   :  { %s1484_s7 = smov 64   ;;  %s1485_s8 = smov 4  }
  0x12   :  { %37 = dma.hbm_to_vmem [thread:$0]  %s1783_s1, 256, %s32_s22, [#allocation6], %s1484_s7, %s1484_s7, %s1485_s8  }
  0x13   :  { %s1486_s11 = smov [#allocation2]   ;;  %s1411_s15 = scalar_lea.hbm %s1782_s0, 256 }
  0x14   :  { %s19_s12 = sshll.u32 %s1486_s11, 4  ;;  %p1412_p8 = scmp.ne.s32.totalorder %s1782_s0, %s1411_s15  ;;  %s20_s12 = int_to_ptr.vmem [resolvable:$true] %s19_s12 }
  0x15   :  { %p1415_p9 = scmp.lt.u32.totalorder %s1411_s15, %s1782_s0 }
  0x17   :  { %p1417_p10 = pnand %p1415_p9, %p1412_p8 }
  0x19   :  { %1420 = shalt.err (!%p1417_p10)
}
  0x1a   :  { %s1421_s20 = scalar_lea.vmem %s20_s12, 256  ;;  %p1426_p12 = scmp.lt.s32.totalorder %s20_s12, %s20_s12 }
  0x1b   :  { %p1422_p11 = scmp.ne.s32.totalorder %s20_s12, %s1421_s20  ;;  %p1427_p13 = scmp.lt.s32.totalorder %s1421_s20, %s1421_s20 }
  0x1d   :  { %p1428_p0 = por %p1427_p13, %p1426_p12 }
  0x1f   :  { %p1429_p1 = pnand %p1428_p0, %p1422_p11 }
  0x21   :  { %1432 = shalt.err (!%p1429_p1)
}
  0x22   :  { %s1487_s1 = smov 128   ;;  %s1488_s21 = smov 8  }
  0x23   :  { %25 = dma.hbm_to_vmem [thread:$0]  %s1782_s0, 256, %s20_s12, [#allocation3], %s1487_s1, %s1487_s1, %s1488_s21  }
  0x24   :  { %s1489_s24 = smov [#allocation7]   ;;  %s1433_s28 = scalar_lea.hbm %s1785_s3, 256 }
  0x25   :  { %s45_s25 = sshll.u32 %s1489_s24, 4  ;;  %p1434_p2 = scmp.ne.s32.totalorder %s1785_s3, %s1433_s28  ;;  %s46_s25 = int_to_ptr.vmem [resolvable:$true] %s45_s25 }
  0x26   :  { %p1437_p3 = scmp.lt.u32.totalorder %s1433_s28, %s1785_s3 }
  0x28   :  { %p1439_p4 = pnand %p1437_p3, %p1434_p2 }
  0x2a   :  { %1442 = shalt.err (!%p1439_p4)
}
  0x2b   :  { %s1443_s11 = scalar_lea.vmem %s46_s25, 256  ;;  %p1448_p6 = scmp.lt.s32.totalorder %s46_s25, %s46_s25 }
  0x2c   :  { %p1444_p5 = scmp.ne.s32.totalorder %s46_s25, %s1443_s11  ;;  %p1449_p7 = scmp.lt.s32.totalorder %s1443_s11, %s1443_s11 }
  0x2e   :  { %p1450_p8 = por %p1449_p7, %p1448_p6 }
  0x30   :  { %p1451_p9 = pnand %p1450_p8, %p1444_p5 }
  0x32   :  { %1454 = shalt.err (!%p1451_p9)
}
  0x33   :  { %51 = dma.hbm_to_vmem [thread:$0]  %s1785_s3, 256, %s46_s25, [#allocation6], %s1484_s7, %s1484_s7, %s1485_s8  }
  0x34   :  { %1477 = dma.done.wait [#allocation3], 256  }
  0x35   :  { %1478 = vsyncadd [#allocation3], 4294967040 }
  0x36   :  { %1479 = dma.done.wait [#allocation6], 512  }
  0x37   :  { %1480 = vsyncadd [#allocation6], 4294966784  ;;  %v1490_v0 = vmov 0.0   ;;  %vm1491_vm0 = vmmov 0   ;;  %v1353_v1 = vld [vmem:[#allocation5] sm:$0xff]   ;;  %v1354_v2 = vld [vmem:[#allocation5 + $0x8] sm:$0xff]   ;;  %v75_v6 = vlaneseq }
  0x38   :  { %1219 = vmatprep.subr.bf16.mxu0 %v1490_v0  ;;  %1223 = vmatprep.mubr.msk.bf16.mxu0 %vm1491_vm0, %v1490_v0  ;;  %v66_v3 = vld [vmem:[#allocation2] sm:$0xff]  ;;  %v67_v4 = vld [vmem:[#allocation2 + $0x8] sm:$0xff]  ;;  %vm91_vm1 = vcmask 261120   ;;  %s1492_s13 = smov 96   ;;  %vm145_vm2 = vcmask 64512   ;;  %vm269_vm3 = vcmask 1043456  }
  0x39   :  { %1227 = vmatprep.subr.bf16.mxu1 %v1490_v0  ;;  %1229 = vmatprep.mubr.msk.bf16.mxu1 %vm1491_vm0, %v1490_v0  ;;  %v68_v5 = vpack.c.bf16 %v67_v4, %v66_v3  ;;  %v1596_v7 = vshrl.u32 %v75_v6, 7  ;;  %v73_v8 = vld [vmem:[%s1784_s2] sm:$0x1]  ;;  %s1495_s15 = smov 56   ;;  %s1496_s16 = smov 80   ;;  %vm1053_vm4 = vcmask 130048  }
  0x3a   :  { %1220 = vmatpush3.bf16.msra.mxu0 %v1353_v1  ;;  %v74_v9 = vunpack.c.l.bf16 %v73_v8  ;;  %v1625_v24 = vld [vmem:[%s1787_s5] sm:$0xff]  ;;  %s1493_s5 = smov 88   ;;  %s1497_s17 = smov 112   ;;  %vm1058_vm5 = vcmask 195584  }
  0x3b   :  { %1221 = vmatprep.subr.bf16.mxu0 %v1490_v0  ;;  %v77_v10 = vsub.s32 0, %v1596_v7  ;;  %s1498_s18 = smov 48   ;;  %s1499_s19 = smov 72  }
  0x3c   :  { %s1500_s20 = smov 104   ;;  %s1501_s22 = smov 40  }
  0x3d   :  { %v78_v11 = vrot.slane %v74_v9, %v77_v10  ;;  %s1502_s23 = smov 16   ;;  %s1503_s24 = smov 24  }
  0x3e   :  { %1222 = vmatpush3.bf16.msra.mxu0 %v1354_v2  ;;  %s1504_s27 = smov [#allocation8]  }
  0x3f   :  { %1233 = vmatprep.subr.bf16.mxu0 %v1490_v0  ;;  %s1141_s28 = sshll.u32 %s1504_s27, 4  ;;  %s1142_s28 = int_to_ptr.vmem [resolvable:$true] %s1141_s28 }
  0x40   :  { %s1455_s29 = scalar_lea.vmem %s1142_s28, 256  ;;  %p1460_p11 = scmp.lt.s32.totalorder %s1142_s28, %s1142_s28 }
  0x41   :  { %1224 = vmatmul.mubr.msk.bf16.vlgmr.msra.gmra.mrb[0].mxu0 %vm91_vm1, %v68_v5  ;;  %p1456_p10 = scmp.ne.s32.totalorder %s1142_s28, %s1455_s29  ;;  %p1461_p12 = scmp.lt.s32.totalorder %s1455_s29, %s1455_s29 }
  0x42   :  { %1235 = vmatprep.mubr.msk.bf16.mxu0 %vm1491_vm0, %v1490_v0 }
  0x43   :  { %p1462_p13 = por %p1461_p12, %p1460_p11 }
  0x45   :  { %p1463_p0 = pnand %p1462_p13, %p1456_p10 }
 0x114   :  { %v129_v12 = vpop.f32.mrb[0].mxu0 }
 0x115   :  { %v130_v13 = vadd.f32 %v129_v12, %v78_v11  ;;  %v1225_v14 = vpop.f32.mrb[1].mxu0 }
 0x116   :  { %v132_v15 = vpop.f32.mrb[2].mxu0 }
 0x117   :  { %v1604_v16 = vpack.c.bf16 %v130_v13, %v130_v13  ;;  %v133_v17 = vadd.f32 %v132_v15, %v78_v11  ;;  %v1226_v18 = vpop.f32.mrb[3].mxu0 }
 0x119   :  { %143 = vrot.lane.b32.xlu0 %v1604_v16, %s1492_s13  ;;  %v1607_v19 = vpack.c.bf16 %v133_v17, %v133_v17 }
 0x11d   :  { %192 = vrot.lane.b32.xlu0 %v1607_v19, %s1492_s13 }
 0x18b   :  { %v144_v20 = vpop.permute.xlu0 %143 }
 0x18c   :  { %v150_v21 = vsel %vm145_vm2, %v144_v20, 0 }
 0x18d   :  { %1228 = vmatpush3.bf16.xpose.msra.mxu1 %v150_v21 }
 0x18e   :  { %1239 = vmatprep.subr.bf16.mxu1 %v1490_v0 }
 0x18f   :  { %v193_v22 = vpop.permute.xlu0 %192 }
 0x190   :  { %v198_v23 = vsel %vm145_vm2, %v193_v22, 0 }
 0x191   :  { %1234 = vmatpush3.bf16.xpose.msra.mxu0 %v198_v23 }
 0x192   :  { %1245 = vmatprep.subr.bf16.mxu0 %v1490_v0 }
 0x194   :  { %1230 = vmatmul.mubr.msk.bf16.vlgmr.msra.gmra.mrb[0].mxu1 %vm145_vm2, %v1604_v16 }
 0x195   :  { %1241 = vmatprep.mubr.msk.bf16.mxu1 %vm1491_vm0, %v1490_v0 }
 0x198   :  { %1236 = vmatmul.mubr.msk.bf16.vlgmr.msra.gmra.mrb[4].mxu0 %vm145_vm2, %v1607_v19 }
 0x199   :  { %1247 = vmatprep.mubr.msk.bf16.mxu0 %vm1491_vm0, %v1490_v0 }
 0x267   :  { %v186_v25 = vpop.f32.mrb[0].mxu1 }
 0x268   :  { %v187_v26 = vadd.f32 %v186_v25, %v1625_v24  ;;  %v1231_v27 = vpop.f32.mrb[1].mxu1 }
 0x269   :  { %v189_v28 = vpop.f32.mrb[2].mxu1 }
 0x26a   :  { %v1232_v29 = vpop.f32.mrb[3].mxu1  ;;  %v240_v30 = vsel %vm145_vm2, %v187_v26, -inf }
 0x26b   :  { %241 = vmax.xlane.f32.xlu1 %v240_v30  ;;  %v234_v31 = vpop.f32.mrb[4].mxu0 }
 0x26c   :  { %v235_v32 = vadd.f32 %v234_v31, %v1625_v24  ;;  %v1237_v33 = vpop.f32.mrb[5].mxu0 }
 0x26d   :  { %v237_v34 = vpop.f32.mrb[6].mxu0 }
 0x26e   :  { %v1238_v35 = vpop.f32.mrb[7].mxu0  ;;  %v243_v36 = vsel %vm145_vm2, %v235_v32, -inf }
 0x26f   :  { %244 = vmax.xlane.f32.xlu1 %v243_v36 }
 0x280   :  { %264 = vrot.lane.b32.xlu1 %v1604_v16, %s1484_s7 }
 0x284   :  { %313 = vrot.lane.b32.xlu1 %v1607_v19, %s1484_s7  ;;  %s1494_s7 = smov 120  }
 0x288   :  { %365 = vrot.lane.b32.xlu1 %v1604_v16, %s1493_s5 }
 0x2f8   :  { %v242_v37 = vpop.xlane.xlu1 %241 }
 0x2f9   :  { %v246_v38 = vsub.f32 %v187_v26, %v242_v37 }
 0x2fb   :  { %v248_v39 = vmul.f32 1.442695, %v246_v38 }
 0x2fc   :  { %v245_v40 = vpop.xlane.xlu1 %244 }
 0x2fd   :  { %1357 = vpow2.f32 %v248_v39  ;;  %v247_v41 = vsub.f32 %v235_v32, %v245_v40 }
 0x2ff   :  { %v250_v42 = vmul.f32 1.442695, %v247_v41 }
 0x300   :  { %v265_v43 = vpop.permute.xlu1 %264 }
 0x301   :  { %1359 = vpow2.f32 %v250_v42  ;;  %v271_v44 = vsel %vm269_vm3, %v265_v43, 0 }
 0x302   :  { %1240 = vmatpush3.bf16.msra.mxu1 %v271_v44 }
 0x303   :  { %1251 = vmatprep.subr.bf16.mxu1 %v1490_v0 }
 0x304   :  { %v314_v45 = vpop.permute.xlu1 %313 }
 0x305   :  { %v319_v46 = vsel %vm269_vm3, %v314_v45, 0 }
 0x306   :  { %1246 = vmatpush3.bf16.msra.mxu0 %v319_v46 }
 0x307   :  { %v1358_v47 = vpop.eup %1357  ;;  %1257 = vmatprep.subr.bf16.mxu0 %v1490_v0 }
 0x308   :  { %v252_v48 = vsel %vm145_vm2, %v1358_v47, 0.0  ;;  %v366_v51 = vpop.permute.xlu1 %365 }
 0x309   :  { %253 = vadd.xlane.f32.xlu0 %v252_v48  ;;  %v371_v58 = vsel %vm145_vm2, %v366_v51, 0 }
 0x30b   :  { %v1360_v49 = vpop.eup %1359 }
 0x30c   :  { %v255_v50 = vsel %vm145_vm2, %v1360_v49, 0.0 }
 0x30d   :  { %256 = vadd.xlane.f32.xlu1 %v255_v50 }
 0x31e   :  { %415 = vrot.lane.b32.xlu1 %v1607_v19, %s1493_s5 }
 0x31f   :  { %363 = vrot.lane.b32.xlu0 %v1604_v16, %s1494_s7 }
 0x322   :  { %413 = vrot.lane.b32.xlu1 %v1607_v19, %s1494_s7 }
 0x396   :  { %v254_v52 = vpop.xlane.xlu0 %253 }
 0x397   :  { %1361 = vrcp.f32 %v254_v52 }
 0x39a   :  { %v257_v53 = vpop.xlane.xlu1 %256  ;;  %v364_v63 = vpop.permute.xlu0 %363 }
 0x39b   :  { %1363 = vrcp.f32 %v257_v53 }
 0x39e   :  { %v416_v60 = vpop.permute.xlu1 %415 }
 0x39f   :  { %v421_v62 = vsel %vm145_vm2, %v416_v60, 0 }
 0x3a1   :  { %v1362_v54 = vpop.eup %1361 }
 0x3a2   :  { %v260_v55 = vmul.f32 %v1362_v54, %v1358_v47  ;;  %v414_v1 = vpop.permute.xlu1 %413 }
 0x3a4   :  { %v262_v56 = vpack.c.bf16 %v260_v55, %v260_v55 }
 0x3a5   :  { %v1364_v57 = vpop.eup %1363 }
 0x3a6   :  { %v261_v59 = vmul.f32 %v1364_v57, %v1360_v49  ;;  %1242 = vmatmul.mubr.msk.bf16.vlgmr.msra.gmra.mrb[4].mxu1 %vm145_vm2, %v262_v56 }
 0x3a7   :  { %1252 = vmatpush3.bf16.xpose.msra.mxu1 %v371_v58  ;;  %1253 = vmatprep.mubr.msk.bf16.mxu1 %vm1491_vm0, %v1490_v0 }
 0x3a8   :  { %v263_v61 = vpack.c.bf16 %v261_v59, %v261_v59  ;;  %1263 = vmatprep.subr.bf16.mxu1 %v1490_v0 }
 0x3aa   :  { %1248 = vmatmul.mubr.msk.bf16.vlgmr.msra.gmra.mrb[8].mxu0 %vm145_vm2, %v263_v61 }
 0x3ab   :  { %1258 = vmatpush3.bf16.xpose.msra.mxu0 %v421_v62  ;;  %1259 = vmatprep.mubr.msk.bf16.mxu0 %vm1491_vm0, %v1490_v0 }
 0x3ac   :  { %1269 = vmatprep.subr.bf16.mxu0 %v1490_v0 }
 0x3ae   :  { %1254 = vmatmul.mubr.msk.bf16.vlgmr.msra.gmra.mrb[8].mxu1 %vm145_vm2, %v364_v63 }
 0x3af   :  { %1265 = vmatprep.mubr.msk.bf16.mxu1 %vm1491_vm0, %v1490_v0 }
 0x3b2   :  { %1260 = vmatmul.mubr.msk.bf16.vlgmr.msra.gmra.mrb[12].mxu0 %vm145_vm2, %v414_v1 }
 0x3b3   :  { %1271 = vmatprep.mubr.msk.bf16.mxu0 %vm1491_vm0, %v1490_v0 }
 0x479   :  { %v1661_v2 = vpop.f32.mrb[4].mxu1 }
 0x47a   :  { %v1243_v3 = vpop.f32.mrb[5].mxu1 }
 0x47b   :  { %v310_v4 = vpop.f32.mrb[6].mxu1 }
 0x47c   :  { %v1244_v5 = vpop.f32.mrb[7].mxu1 }
 0x47d   :  { %v1663_v6 = vpop.f32.mrb[8].mxu0 }
 0x47e   :  { %v1249_v8 = vpop.f32.mrb[9].mxu0 }
 0x47f   :  { %v358_v9 = vpop.f32.mrb[10].mxu0 }
 0x480   :  { %v1250_v11 = vpop.f32.mrb[11].mxu0 }
 0x481   :  { %v407_v12 = vpop.f32.mrb[8].mxu1 }
 0x482   :  { %v408_v13 = vadd.f32 %v407_v12, %v1625_v24  ;;  %v1255_v14 = vpop.f32.mrb[9].mxu1 }
 0x483   :  { %v410_v15 = vpop.f32.mrb[10].mxu1 }
 0x484   :  { %v1256_v17 = vpop.f32.mrb[11].mxu1  ;;  %v463_v18 = vsel %vm145_vm2, %v408_v13, -inf }
 0x485   :  { %464 = vmax.xlane.f32.xlu1 %v463_v18  ;;  %v457_v20 = vpop.f32.mrb[12].mxu0 }
 0x486   :  { %v458_v21 = vadd.f32 %v457_v20, %v1625_v24  ;;  %v1261_v22 = vpop.f32.mrb[13].mxu0 }
 0x487   :  { %v460_v23 = vpop.f32.mrb[14].mxu0 }
 0x488   :  { %v1262_v25 = vpop.f32.mrb[15].mxu0  ;;  %v466_v26 = vsel %vm145_vm2, %v458_v21, -inf }
 0x489   :  { %467 = vmax.xlane.f32.xlu0 %v466_v26 }
 0x496   :  { %487 = vrot.lane.b32.xlu1 %v1604_v16, %s1495_s15 }
 0x49a   :  { %587 = vrot.lane.b32.xlu1 %v1604_v16, %s1496_s16 }
 0x49f   :  { %535 = vrot.lane.b32.xlu0 %v1607_v19, %s1495_s15 }
 0x4a3   :  { %585 = vrot.lane.b32.xlu0 %v1604_v16, %s1497_s17 }
 0x512   :  { %v465_v27 = vpop.xlane.xlu1 %464 }
 0x513   :  { %v469_v28 = vsub.f32 %v408_v13, %v465_v27 }
 0x515   :  { %v471_v29 = vmul.f32 1.442695, %v469_v28 }
 0x516   :  { %v488_v30 = vpop.permute.xlu1 %487  ;;  %v468_v31 = vpop.xlane.xlu0 %467 }
 0x517   :  { %1365 = vpow2.f32 %v471_v29  ;;  %v493_v32 = vsel %vm269_vm3, %v488_v30, 0  ;;  %v470_v33 = vsub.f32 %v458_v21, %v468_v31 }
 0x518   :  { %1264 = vmatpush3.bf16.msra.mxu1 %v493_v32 }
 0x519   :  { %v473_v34 = vmul.f32 1.442695, %v470_v33  ;;  %1275 = vmatprep.subr.bf16.mxu1 %v1490_v0 }
 0x51a   :  { %v536_v35 = vpop.permute.xlu0 %535  ;;  %v588_v41 = vpop.permute.xlu1 %587 }
 0x51b   :  { %1367 = vpow2.f32 %v473_v34  ;;  %v541_v36 = vsel %vm269_vm3, %v536_v35, 0  ;;  %v593_v48 = vsel %vm145_vm2, %v588_v41, 0 }
 0x51c   :  { %1270 = vmatpush3.bf16.msra.mxu0 %v541_v36 }
 0x51d   :  { %1281 = vmatprep.subr.bf16.mxu0 %v1490_v0 }
 0x51e   :  { %v586_v53 = vpop.permute.xlu0 %585 }
 0x521   :  { %v1366_v37 = vpop.eup %1365 }
 0x522   :  { %v475_v38 = vsel %vm145_vm2, %v1366_v37, 0.0 }
 0x523   :  { %476 = vadd.xlane.f32.xlu1 %v475_v38 }
 0x525   :  { %v1368_v39 = vpop.eup %1367 }
 0x526   :  { %v478_v40 = vsel %vm145_vm2, %v1368_v39, 0.0 }
 0x527   :  { %479 = vadd.xlane.f32.xlu1 %v478_v40 }
 0x538   :  { %637 = vrot.lane.b32.xlu1 %v1607_v19, %s1496_s16 }
 0x53c   :  { %635 = vrot.lane.b32.xlu1 %v1607_v19, %s1497_s17 }
 0x5b0   :  { %v477_v42 = vpop.xlane.xlu1 %476 }
 0x5b1   :  { %1369 = vrcp.f32 %v477_v42 }
 0x5b4   :  { %v480_v43 = vpop.xlane.xlu1 %479 }
 0x5b5   :  { %1371 = vrcp.f32 %v480_v43 }
 0x5b8   :  { %v638_v50 = vpop.permute.xlu1 %637 }
 0x5b9   :  { %v643_v52 = vsel %vm145_vm2, %v638_v50, 0 }
 0x5bb   :  { %v1370_v44 = vpop.eup %1369 }
 0x5bc   :  { %v483_v45 = vmul.f32 %v1370_v44, %v1366_v37  ;;  %v636_v54 = vpop.permute.xlu1 %635 }
 0x5be   :  { %v485_v46 = vpack.c.bf16 %v483_v45, %v483_v45 }
 0x5bf   :  { %v1372_v47 = vpop.eup %1371 }
 0x5c0   :  { %v484_v49 = vmul.f32 %v1372_v47, %v1368_v39  ;;  %1266 = vmatmul.mubr.msk.bf16.vlgmr.msra.gmra.mrb[12].mxu1 %vm145_vm2, %v485_v46 }
 0x5c1   :  { %1276 = vmatpush3.bf16.xpose.msra.mxu1 %v593_v48  ;;  %1277 = vmatprep.mubr.msk.bf16.mxu1 %vm1491_vm0, %v1490_v0 }
 0x5c2   :  { %v486_v51 = vpack.c.bf16 %v484_v49, %v484_v49  ;;  %1287 = vmatprep.subr.bf16.mxu1 %v1490_v0 }
 0x5c4   :  { %1272 = vmatmul.mubr.msk.bf16.vlgmr.msra.gmra.mrb[16].mxu0 %vm145_vm2, %v486_v51 }
 0x5c5   :  { %1282 = vmatpush3.bf16.xpose.msra.mxu0 %v643_v52  ;;  %1283 = vmatprep.mubr.msk.bf16.mxu0 %vm1491_vm0, %v1490_v0 }
 0x5c6   :  { %1293 = vmatprep.subr.bf16.mxu0 %v1490_v0 }
 0x5c8   :  { %1278 = vmatmul.mubr.msk.bf16.vlgmr.msra.gmra.mrb[16].mxu1 %vm145_vm2, %v586_v53 }
 0x5c9   :  { %1289 = vmatprep.mubr.msk.bf16.mxu1 %vm1491_vm0, %v1490_v0 }
 0x5cc   :  { %1284 = vmatmul.mubr.msk.bf16.vlgmr.msra.gmra.mrb[20].mxu0 %vm145_vm2, %v636_v54 }
 0x5cd   :  { %1295 = vmatprep.mubr.msk.bf16.mxu0 %vm1491_vm0, %v1490_v0 }
 0x693   :  { %v1697_v55 = vpop.f32.mrb[12].mxu1 }
 0x694   :  { %v1267_v56 = vpop.f32.mrb[13].mxu1 }
 0x695   :  { %v532_v57 = vpop.f32.mrb[14].mxu1 }
 0x696   :  { %v1268_v58 = vpop.f32.mrb[15].mxu1 }
 0x697   :  { %v1699_v59 = vpop.f32.mrb[16].mxu0 }
 0x698   :  { %v1273_v60 = vpop.f32.mrb[17].mxu0 }
 0x699   :  { %v580_v61 = vpop.f32.mrb[18].mxu0 }
 0x69a   :  { %v1274_v62 = vpop.f32.mrb[19].mxu0 }
 0x69b   :  { %v629_v63 = vpop.f32.mrb[16].mxu1 }
 0x69c   :  { %v630_v1 = vadd.f32 %v629_v63, %v1625_v24  ;;  %v1279_v3 = vpop.f32.mrb[17].mxu1 }
 0x69d   :  { %v632_v4 = vpop.f32.mrb[18].mxu1 }
 0x69e   :  { %v1280_v5 = vpop.f32.mrb[19].mxu1  ;;  %v685_v8 = vsel %vm145_vm2, %v630_v1, -inf }
 0x69f   :  { %686 = vmax.xlane.f32.xlu0 %v685_v8  ;;  %v679_v9 = vpop.f32.mrb[20].mxu0 }
 0x6a0   :  { %v680_v11 = vadd.f32 %v679_v9, %v1625_v24  ;;  %v1285_v12 = vpop.f32.mrb[21].mxu0  ;;  %v583_v9 = vpack.c.bf16 %v1697_v55, %v1697_v55 }
 0x6a1   :  { %v682_v13 = vpop.f32.mrb[22].mxu0 }
 0x6a2   :  { %v1286_v14 = vpop.f32.mrb[23].mxu0  ;;  %v688_v15 = vsel %vm145_vm2, %v680_v11, -inf }
 0x6a3   :  { %689 = vmax.xlane.f32.xlu1 %v688_v15 }
 0x6b4   :  { %709 = vrot.lane.b32.xlu1 %v1604_v16, %s1498_s18 }
 0x6b8   :  { %809 = vrot.lane.b32.xlu1 %v1604_v16, %s1499_s19 }
 0x6bc   :  { %859 = vrot.lane.b32.xlu1 %v1607_v19, %s1499_s19 }
 0x6c0   :  { %857 = vrot.lane.b32.xlu1 %v1607_v19, %s1500_s20 }
 0x72c   :  { %v687_v17 = vpop.xlane.xlu0 %686 }
 0x72d   :  { %v691_v18 = vsub.f32 %v630_v1, %v687_v17 }
 0x72f   :  { %v693_v20 = vmul.f32 1.442695, %v691_v18 }
 0x730   :  { %v690_v21 = vpop.xlane.xlu1 %689 }
 0x731   :  { %1373 = vpow2.f32 %v693_v20  ;;  %v692_v22 = vsub.f32 %v680_v11, %v690_v21  ;;  %v584_v11 = vpack.c.bf16 %v1699_v59, %v1699_v59 }
 0x733   :  { %v695_v23 = vmul.f32 1.442695, %v692_v22 }
 0x734   :  { %v710_v25 = vpop.permute.xlu1 %709 }
 0x735   :  { %1375 = vpow2.f32 %v695_v23  ;;  %v715_v26 = vsel %vm269_vm3, %v710_v25, 0 }
 0x736   :  { %1288 = vmatpush3.bf16.msra.mxu1 %v715_v26 }
 0x737   :  { %1299 = vmatprep.subr.bf16.mxu1 %v1490_v0 }
 0x738   :  { %v810_v36 = vpop.permute.xlu1 %809 }
 0x739   :  { %v815_v40 = vsel %vm145_vm2, %v810_v36, 0 }
 0x73b   :  { %v1374_v27 = vpop.eup %1373 }
 0x73c   :  { %v697_v28 = vsel %vm145_vm2, %v1374_v27, 0.0  ;;  %v860_v42 = vpop.permute.xlu1 %859 }
 0x73d   :  { %698 = vadd.xlane.f32.xlu0 %v697_v28  ;;  %v865_v44 = vsel %vm145_vm2, %v860_v42, 0 }
 0x73f   :  { %v1376_v29 = vpop.eup %1375 }
 0x740   :  { %v700_v30 = vsel %vm145_vm2, %v1376_v29, 0.0  ;;  %v858_v46 = vpop.permute.xlu1 %857 }
 0x741   :  { %701 = vadd.xlane.f32.xlu0 %v700_v30 }
 0x757   :  { %757 = vrot.lane.b32.xlu0 %v1607_v19, %s1498_s18 }
 0x75b   :  { %807 = vrot.lane.b32.xlu0 %v1604_v16, %s1500_s20 }
 0x7ca   :  { %v699_v31 = vpop.xlane.xlu0 %698 }
 0x7cb   :  { %1377 = vrcp.f32 %v699_v31 }
 0x7ce   :  { %v702_v32 = vpop.xlane.xlu0 %701 }
 0x7cf   :  { %1379 = vrcp.f32 %v702_v32 }
 0x7d2   :  { %v758_v33 = vpop.permute.xlu0 %757 }
 0x7d3   :  { %v763_v34 = vsel %vm269_vm3, %v758_v33, 0 }
 0x7d4   :  { %1294 = vmatpush3.bf16.msra.mxu0 %v763_v34  ;;  %v1355_v34 = vld [vmem:[#allocation7] sm:$0xff]  }
 0x7d5   :  { %v1378_v35 = vpop.eup %1377  ;;  %1305 = vmatprep.subr.bf16.mxu0 %v1490_v0 }
 0x7d6   :  { %v705_v37 = vmul.f32 %v1378_v35, %v1374_v27  ;;  %v808_v45 = vpop.permute.xlu0 %807  ;;  %v1356_v35 = vld [vmem:[#allocation7 + $0x8] sm:$0xff]  }
 0x7d8   :  { %v707_v38 = vpack.c.bf16 %v705_v37, %v705_v37 }
 0x7d9   :  { %v1380_v39 = vpop.eup %1379 }
 0x7da   :  { %v706_v41 = vmul.f32 %v1380_v39, %v1376_v29  ;;  %1290 = vmatmul.mubr.msk.bf16.vlgmr.msra.gmra.mrb[20].mxu1 %vm145_vm2, %v707_v38 }
 0x7db   :  { %1300 = vmatpush3.bf16.xpose.msra.mxu1 %v815_v40  ;;  %1301 = vmatprep.mubr.msk.bf16.mxu1 %vm1491_vm0, %v1490_v0 }
 0x7dc   :  { %v708_v43 = vpack.c.bf16 %v706_v41, %v706_v41  ;;  %1311 = vmatprep.subr.bf16.mxu1 %v1490_v0 }
 0x7de   :  { %1296 = vmatmul.mubr.msk.bf16.vlgmr.msra.gmra.mrb[24].mxu0 %vm145_vm2, %v708_v43 }
 0x7df   :  { %1306 = vmatpush3.bf16.xpose.msra.mxu0 %v865_v44  ;;  %1307 = vmatprep.mubr.msk.bf16.mxu0 %vm1491_vm0, %v1490_v0 }
 0x7e0   :  { %1317 = vmatprep.subr.bf16.mxu0 %v1490_v0 }
 0x7e2   :  { %1302 = vmatmul.mubr.msk.bf16.vlgmr.msra.gmra.mrb[24].mxu1 %vm145_vm2, %v808_v45 }
 0x7e3   :  { %1313 = vmatprep.mubr.msk.bf16.mxu1 %vm1491_vm0, %v1490_v0 }
 0x7e6   :  { %1308 = vmatmul.mubr.msk.bf16.vlgmr.msra.gmra.mrb[28].mxu0 %vm145_vm2, %v858_v46 }
 0x7e7   :  { %1319 = vmatprep.mubr.msk.bf16.mxu0 %vm1491_vm0, %v1490_v0 }
 0x8ad   :  { %v751_v47 = vpop.f32.mrb[20].mxu1 }
 0x8ae   :  { %v1291_v48 = vpop.f32.mrb[21].mxu1  ;;  %v805_v23 = vpack.c.bf16 %v751_v47, %v751_v47 }
 0x8af   :  { %v754_v49 = vpop.f32.mrb[22].mxu1 }
 0x8b0   :  { %v1292_v50 = vpop.f32.mrb[23].mxu1 }
 0x8b1   :  { %v799_v51 = vpop.f32.mrb[24].mxu0  ;;  %v362_v50 = vpack.c.bf16 %v1663_v6, %v1663_v6 }
 0x8b2   :  { %v1297_v52 = vpop.f32.mrb[25].mxu0 }
 0x8b3   :  { %v802_v53 = vpop.f32.mrb[26].mxu0 }
 0x8b4   :  { %v1298_v54 = vpop.f32.mrb[27].mxu0 }
 0x8b5   :  { %v851_v56 = vpop.f32.mrb[24].mxu1 }
 0x8b6   :  { %v852_v57 = vadd.f32 %v851_v56, %v1625_v24  ;;  %v1303_v58 = vpop.f32.mrb[25].mxu1 }
 0x8b7   :  { %v854_v60 = vpop.f32.mrb[26].mxu1 }
 0x8b8   :  { %v1304_v61 = vpop.f32.mrb[27].mxu1  ;;  %v907_v62 = vsel %vm145_vm2, %v852_v57, -inf }
 0x8b9   :  { %908 = vmax.xlane.f32.xlu0 %v907_v62  ;;  %v901_v63 = vpop.f32.mrb[28].mxu0 }
 0x8ba   :  { %v902_v1 = vadd.f32 %v901_v63, %v1625_v24  ;;  %v1309_v3 = vpop.f32.mrb[29].mxu0  ;;  %v806_v24 = vpack.c.bf16 %v799_v51, %v799_v51 }
 0x8bb   :  { %v904_v4 = vpop.f32.mrb[30].mxu0 }
 0x8bc   :  { %v1310_v5 = vpop.f32.mrb[31].mxu0  ;;  %v910_v8 = vsel %vm145_vm2, %v902_v1, -inf }
 0x8bd   :  { %911 = vmax.xlane.f32.xlu1 %v910_v8 }
 0x8ce   :  { %931 = vrot.lane.b32.xlu1 %v1604_v16, %s1501_s22 }
 0x8d2   :  { %1031 = vrot.lane.b32.xlu1 %v583_v9, %s1488_s21 }
 0x8d6   :  { %1033 = vrot.lane.b32.xlu1 %v584_v11, %s1488_s21 }
 0x8da   :  { %1039 = vrot.lane.b32.xlu1 %v806_v24, %s1502_s23 }
 0x946   :  { %v909_v12 = vpop.xlane.xlu0 %908 }
 0x947   :  { %v913_v13 = vsub.f32 %v852_v57, %v909_v12 }
 0x949   :  { %v915_v14 = vmul.f32 1.442695, %v913_v13 }
 0x94a   :  { %v912_v15 = vpop.xlane.xlu1 %911 }
 0x94b   :  { %1381 = vpow2.f32 %v915_v14  ;;  %v914_v17 = vsub.f32 %v902_v1, %v912_v15 }
 0x94d   :  { %v917_v16 = vmul.f32 1.442695, %v914_v17 }
 0x94e   :  { %v932_v18 = vpop.permute.xlu1 %931 }
 0x94f   :  { %1383 = vpow2.f32 %v917_v16  ;;  %v937_v55 = vsel %vm269_vm3, %v932_v18, 0 }
 0x950   :  { %1312 = vmatpush3.bf16.msra.mxu1 %v937_v55 }
 0x951   :  { %1323 = vmatprep.subr.bf16.mxu1 %v1490_v0 }
 0x952   :  { %v1032_v46 = vpop.permute.xlu1 %1031 }
 0x955   :  { %v1382_v59 = vpop.eup %1381 }
 0x956   :  { %v919_v20 = vsel %vm145_vm2, %v1382_v59, 0.0  ;;  %v1034_v47 = vpop.permute.xlu1 %1033 }
 0x957   :  { %920 = vadd.xlane.f32.xlu0 %v919_v20  ;;  %v1052_v53 = vsel %vm145_vm2, %v362_v50, %v1034_v47 }
 0x959   :  { %v1384_v21 = vpop.eup %1383 }
 0x95a   :  { %v922_v22 = vsel %vm145_vm2, %v1384_v21, 0.0  ;;  %v1040_v49 = vpop.permute.xlu1 %1039 }
 0x95b   :  { %923 = vadd.xlane.f32.xlu0 %v922_v22  ;;  %v1057_v54 = vsel %vm1053_vm4, %v1052_v53, %v1040_v49 }
 0x971   :  { %979 = vrot.lane.b32.xlu0 %v1607_v19, %s1501_s22 }
 0x975   :  { %1037 = vrot.lane.b32.xlu0 %v805_v23, %s1502_s23 }
 0x9e4   :  { %v921_v25 = vpop.xlane.xlu0 %920 }
 0x9e5   :  { %1385 = vrcp.f32 %v921_v25 }
 0x9e8   :  { %v924_v26 = vpop.xlane.xlu0 %923 }
 0x9e9   :  { %1387 = vrcp.f32 %v924_v26 }
 0x9ec   :  { %v980_v27 = vpop.permute.xlu0 %979 }
 0x9ed   :  { %v985_v28 = vsel %vm269_vm3, %v980_v27, 0 }
 0x9ee   :  { %1318 = vmatpush3.bf16.msra.mxu0 %v985_v28 }
 0x9ef   :  { %v1386_v29 = vpop.eup %1385 }
 0x9f0   :  { %v927_v30 = vmul.f32 %v1386_v29, %v1382_v59  ;;  %v1038_v48 = vpop.permute.xlu0 %1037 }
 0x9f2   :  { %v929_v31 = vpack.c.bf16 %v927_v30, %v927_v30 }
 0x9f3   :  { %v1388_v32 = vpop.eup %1387 }
 0x9f4   :  { %v928_v33 = vmul.f32 %v1388_v32, %v1384_v21  ;;  %1314 = vmatmul.mubr.msk.bf16.vlgmr.msra.gmra.mrb[28].mxu1 %vm145_vm2, %v929_v31 }
 0x9f5   :  { %1327 = vmatprep.mubr.msk.bf16.mxu1 %vm1491_vm0, %v1490_v0  ;;  %1324 = vmatpush3.bf16.msra.mxu1 %v1355_v34 }
 0x9f6   :  { %v930_v19 = vpack.c.bf16 %v928_v33, %v928_v33  ;;  %1325 = vmatprep.subr.bf16.mxu1 %v1490_v0  ;;  %v361_v0 = vpack.c.bf16 %v1661_v2, %v1661_v2  ;;  %v1067_v2 = vld [vmem:[%s1786_s4] sm:$0x1] }
 0x9f7   :  { %v1068_v6 = vunpack.c.l.bf16 %v1067_v2 }
 0x9f8   :  { %1320 = vmatmul.mubr.msk.bf16.vlgmr.msra.gmra.mrb[32].mxu0 %vm145_vm2, %v930_v19  ;;  %v1049_v52 = vsel %vm145_vm2, %v361_v0, %v1032_v46 }
 0x9f9   :  { %1326 = vmatpush3.bf16.msra.mxu1 %v1356_v35  ;;  %v1055_v56 = vsel %vm1053_vm4, %v1049_v52, %v1038_v48  ;;  %v1072_v62 = vrot.slane %v1068_v6, %v77_v10 }
 0xac7   :  { %v973_v36 = vpop.f32.mrb[28].mxu1 }
 0xac8   :  { %v1027_v37 = vpack.c.bf16 %v973_v36, %v973_v36  ;;  %v1315_v38 = vpop.f32.mrb[29].mxu1 }
 0xac9   :  { %v976_v39 = vpop.f32.mrb[30].mxu1 }
 0xaca   :  { %1043 = vrot.lane.b32.xlu0 %v1027_v37, %s1503_s24  ;;  %v1316_v40 = vpop.f32.mrb[31].mxu1 }
 0xacb   :  { %v1021_v41 = vpop.f32.mrb[32].mxu0 }
 0xacc   :  { %v1028_v42 = vpack.c.bf16 %v1021_v41, %v1021_v41  ;;  %v1321_v43 = vpop.f32.mrb[33].mxu0 }
 0xacd   :  { %v1024_v44 = vpop.f32.mrb[34].mxu0 }
 0xace   :  { %1045 = vrot.lane.b32.xlu1 %v1028_v42, %s1503_s24  ;;  %v1322_v45 = vpop.f32.mrb[35].mxu0 }
 0xb3c   :  { %v1044_v51 = vpop.permute.xlu0 %1043 }
 0xb3d   :  { %v1060_v58 = vsel %vm1058_vm5, %v1055_v56, %v1044_v51 }
 0xb40   :  { %v1046_v57 = vpop.permute.xlu1 %1045 }
 0xb41   :  { %v1062_v60 = vsel %vm1058_vm5, %v1057_v54, %v1046_v57 }
 0xb42   :  { %v1175_v61 = vcombine.low %v1060_v58, %v1062_v60 }
 0xb44   :  { %1328 = vmatmul.mubr.msk.bf16.vlgmr.msra.gmra.mrb[32].mxu1 %vm91_vm1, %v1175_v61 }
 0xc17   :  { %v1127_v63 = vpop.f32.mrb[32].mxu1 }
 0xc18   :  { %v1128_v1 = vadd.f32 %v1127_v63, %v1072_v62  ;;  %v1329_v3 = vpop.f32.mrb[33].mxu1 }
 0xc19   :  { %v1130_v4 = vpop.f32.mrb[34].mxu1 }
 0xc1a   :  { %1134 = vst [vmem:[#allocation8] sm:$0xff] %v1128_v1  ;;  %v1131_v5 = vadd.f32 %v1130_v4, %v1072_v62  ;;  %v1330_v8 = vpop.f32.mrb[35].mxu1 }
 0xc1c   :  { %1135 = vst [vmem:[#allocation8 + $0x8] sm:$0xff] %v1131_v5 }
 0xc1d   :  { %1466 = shalt.err (!%p1463_p0)
}
 0xc1e   :  { %s1467_s9 = scalar_lea.hbm %s1788_s6, 256 }
 0xc1f   :  { %p1468_p1 = scmp.ne.s32.totalorder %s1788_s6, %s1467_s9  ;;  %p1471_p2 = scmp.lt.u32.totalorder %s1467_s9, %s1788_s6 }
 0xc21   :  { %p1473_p3 = pnand %p1471_p2, %p1468_p1 }
 0xc23   :  { %1476 = shalt.err (!%p1473_p3)
}
 0xc24   :  { %1147 = dma.vmem_to_hbm [thread:$0]  %s1142_s28, 256, %s1788_s6, [#allocation4], %s1487_s1, %s1487_s1, %s1488_s21  }
 0xc25   :  { %1481 = dma.done.wait [#allocation4], 256  }
 0xc26   :  { %1482 = vsyncadd [#allocation4], 4294967040 }
 0xc27   :  { %1151 = vsyncpa [#allocation3], 1 }
 0xc28   :  { %1152 = vsyncpa [#allocation6], 1 }
 0xc29   :  { %1153 = vsyncpa [#allocation4], 1 }

</bundles_post_ra>
